<compile_context>
chip_gen: v5e
topology: v5e:2x2
jax: 0.10.0
libtpu: 0.0.40
codegen_flags: <defaults>
</compile_context>

<pallas_src>
import jax
import jax.numpy as jnp
from jax import lax
from jax.experimental import pallas as pl
from jax.experimental.pallas import tpu as pltpu


def _dlsdm_kernel(xu_ref, w_ref, o_ref):
    # Single fused MXU matmul:
    #   out[b, o] = sum_k xu[b, k] * W[o, k]  ==  x @ A^T + u @ B^T
    # Contracting on the last axis of BOTH operands means the [out, in] weight is
    # used directly (no transpose copy anywhere). Accumulate in f32.
    o_ref[...] = lax.dot_general(
        xu_ref[...],
        w_ref[...],
        dimension_numbers=(((1,), (1,)), ((), ())),
        preferred_element_type=jnp.float32,
    ).astype(o_ref.dtype)


def dlsdm_forward(x, u, w_a, w_b):
    """
    x:   [B, x_dim]
    u:   [B, u_dim]
    w_a: [x_dim, x_dim]  (PyTorch nn.Linear weight, [out, in])
    w_b: [x_dim, u_dim]  (PyTorch nn.Linear weight, [out, in])
    returns [B, x_dim]
    """
    B, x_dim = x.shape
    u_dim = u.shape[1]
    k_dim = x_dim + u_dim

    # Fuse the two GEMMs into one: concatenate along the contraction ("in") axis.
    # Weights stay in their native [out, in] layout (no transposes).
    xu = jnp.concatenate([x, u], axis=1)        # [B, x_dim + u_dim]
    w = jnp.concatenate([w_a, w_b], axis=1)     # [x_dim, x_dim + u_dim]

    out = pl.pallas_call(
        _dlsdm_kernel,
        out_shape=jax.ShapeDtypeStruct((B, x_dim), x.dtype),
        # Tiny problem: single grid point, full-array blocks, explicitly VMEM.
        # (If B grows large, add a grid over batch with (mult-of-8, x_dim) blocks
        # and mark it "parallel" for the v7x dual TensorCores.)
        in_specs=[
            pl.BlockSpec((B, k_dim), lambda: (0, 0),
                         memory_space=pltpu.MemorySpace.VMEM),
            pl.BlockSpec((x_dim, k_dim), lambda: (0, 0),
                         memory_space=pltpu.MemorySpace.VMEM),
        ],
        out_specs=pl.BlockSpec((B, x_dim), lambda: (0, 0),
                               memory_space=pltpu.MemorySpace.VMEM),
    )(xu, w)
    return out


if __name__ == "__main__":
    # Small shapes implied by the forward: batched state x and control u vectors.
    batch, x_dim, u_dim = 8, 32, 16

    key = jax.random.PRNGKey(0)
    k_x, k_u, k_a, k_b = jax.random.split(key, 4)

    x = jax.random.normal(k_x, (batch, x_dim), dtype=jnp.float32)
    u = jax.random.normal(k_u, (batch, u_dim), dtype=jnp.float32)

    # Deterministic parameter init (nn.Linear weight shapes: [out_features, in_features]).
    w_a = jax.random.normal(k_a, (x_dim, x_dim), dtype=jnp.float32) * 0.1
    w_b = jax.random.normal(k_b, (x_dim, u_dim), dtype=jnp.float32) * 0.1

    out = dlsdm_forward(x, u, w_a, w_b)
    out = jax.block_until_ready(out)

    # Reference check in plain JAX (matches PyTorch: fcA(x) + fcB(u)).
    ref = x @ w_a.T + u @ w_b.T
    assert out.shape == (batch, x_dim)
    assert jnp.allclose(out, ref, atol=1e-5, rtol=1e-5)

    print("KERNEL_OK")
</pallas_src>

<mosaic_0001>
module attributes {stable_mosaic.version = 11 : i64} {
  func.func @_dlsdm_kernel(%arg0: memref<8x48xf32, #tpu.memory_space<vmem>>, %arg1: memref<32x48xf32, #tpu.memory_space<vmem>>, %arg2: memref<8x32xf32, #tpu.memory_space<vmem>>) attributes {dimension_semantics = [], scalar_prefetch = 0 : i64, scratch_operands = 0 : i64, tpu.core_type = #tpu.core_type<tc>} {
    %c0 = arith.constant 0 : index
    %c0_0 = arith.constant 0 : index
    %0 = vector.load %arg0[%c0, %c0_0] : memref<8x48xf32, #tpu.memory_space<vmem>>, vector<8x48xf32>
    %c0_1 = arith.constant 0 : index
    %c0_2 = arith.constant 0 : index
    %1 = vector.load %arg1[%c0_1, %c0_2] : memref<32x48xf32, #tpu.memory_space<vmem>>, vector<32x48xf32>
    %cst = arith.constant dense<0.000000e+00> : vector<8x32xf32>
    %2 = tpu.matmul %0, %1, %cst {dimension_numbers = #tpu.dot_dimension_numbers<[1], [1], [0], [0], [0, 0, 1, 0], [], []>} : vector<8x48xf32>, vector<32x48xf32>, vector<8x32xf32> -> vector<8x32xf32>
    %c0_3 = arith.constant 0 : index
    %c0_4 = arith.constant 0 : index
    %3 = vector.load %arg2[%c0_3, %c0_4] : memref<8x32xf32, #tpu.memory_space<vmem>>, vector<8x32xf32>
    tpu.vector_store %arg2[%c0_3, %c0_4], %2 {strides = array<i32>} : memref<8x32xf32, #tpu.memory_space<vmem>>, vector<8x32xf32>,
    return
  }
}

</mosaic_0001>

<bundles_post_ra>
// kernel: tpu_custom_call.1
= control target key start
LH: loop header
LB: loop body
LE: loop exit
PB: predicated region body
PF: predicated region fallthrough
CT: control target
= control target key end

     0   :  { %7 = vsyncpa [#allocation3], 0  ;;  %s220_s0 = inlined_call_operand.hbm [shape: f32[8,48], index: 0, kind: input, shape index: {}]   ;;  %s221_s1 = inlined_call_operand.hbm [shape: f32[32,48], index: 1, kind: input, shape index: {}]   ;;  %s222_s2 = inlined_call_operand.hbm [shape: f32[8,32], index: 2, kind: output, shape index: {}]  }
   0x1   :  { %8 = vsyncpa [#allocation6], 0 }
   0x2   :  { %9 = vsyncpa [#allocation4], 0  ;;  %s15_s11 = sshll.u32 %s220_s0, 4  ;;  %s191_s12 = smov [#allocation2]   ;;  %s16_s11 = int_to_ptr.hbm [resolvable:$true] %s15_s11 }
   0x3   :  { %s17_s13 = sshll.u32 %s191_s12, 4  ;;  %s25_s16 = sshll.u32 %s221_s1, 4  ;;  %s18_s13 = int_to_ptr.vmem [resolvable:$true] %s17_s13  ;;  %s26_s16 = int_to_ptr.hbm [resolvable:$true] %s25_s16 }
   0x4   :  { %20 = dma.hbm_to_vmem [thread:$0]  %s16_s11, 128, %s18_s13, [#allocation3]  }
   0x5   :  { %s192_s17 = smov [#allocation5]   ;;  %s193_s19 = smov 128  }
   0x6   :  { %s27_s18 = sshll.u32 %s192_s17, 4  ;;  %s194_s20 = smov 8   ;;  %s28_s18 = int_to_ptr.vmem [resolvable:$true] %s27_s18 }
   0x7   :  { %33 = dma.hbm_to_vmem [thread:$0]  %s26_s16, 512, %s28_s18, [#allocation6], %s193_s19, %s193_s19, %s194_s20  }
   0x8   :  { %185 = dma.done.wait [#allocation3], 128  }
   0x9   :  { %186 = vsyncadd [#allocation3], 4294967168 }
   0xa   :  { %187 = dma.done.wait [#allocation6], 512  }
   0xb   :  { %188 = vsyncadd [#allocation6], 4294966784  ;;  %vm47_vm0 = vcmask 392192   ;;  %v46_v0 = vld [vmem:[#allocation5 + $0x18] sm:$0xff]  ;;  %v45_v1 = vld [vmem:[#allocation5 + $0x10] sm:$0xff]  ;;  %s195_s0 = smov [#allocation7]  }
   0xc   :  { %103 = vmatpush.xpose.msk.msra.mxu0 %vm47_vm0, %v46_v0  ;;  %v44_v2 = vld [vmem:[#allocation5 + $0x8] sm:$0xff]  ;;  %v43_v3 = vld [vmem:[#allocation5] sm:$0xff]  ;;  %v42_v4 = vld [vmem:[#allocation2] sm:$0xff]  ;;  %s90_s1 = sshll.u32 %s195_s0, 4  ;;  %s92_s23 = sshll.u32 %s222_s2, 4  ;;  %vm83_vm1 = vcmask 261120   ;;  %s91_s1 = int_to_ptr.vmem [resolvable:$true] %s90_s1  ;;  %s93_s23 = int_to_ptr.hbm [resolvable:$true] %s92_s23 }
  0x10   :  { %104 = vmatpush.xpose.msk.msra.mxu0 %vm47_vm0, %v45_v1 }
  0x14   :  { %105 = vmatpush.xpose.msk.msra.mxu0 %vm47_vm0, %v44_v2 }
  0x18   :  { %106 = vmatpush.xpose.msk.msra.mxu0 %vm47_vm0, %v43_v3 }
  0x1b   :  { %107 = vmatmul.msk.f32.vlgmr.msra.gmra.mxu0 %vm47_vm0, %v42_v4 }
  0x98   :  { %v80_v5 = vpop.f32.mrf.mxu0 }
  0x99   :  { %84 = vst.msk [vmem:[#allocation7] sm:$0xff] %vm83_vm1, %v80_v5 }
  0x9a   :  { %95 = dma.vmem_to_hbm [thread:$0]  %s91_s1, 128, %s93_s23, [#allocation4]  }
  0x9b   :  { %189 = dma.done.wait [#allocation4], 128  }
  0x9c   :  { %190 = vsyncadd [#allocation4], 4294967168 }
  0x9d   :  { %100 = vsyncpa [#allocation3], 1 }
  0x9e   :  { %101 = vsyncpa [#allocation6], 1 }
  0x9f   :  { %102 = vsyncpa [#allocation4], 1 }

</bundles_post_ra>
